<compile_context>
chip_gen: v5e
topology: v5e:2x2
jax: 0.10.0
libtpu: 0.0.40
codegen_flags: <defaults>
</compile_context>

<pallas_src>
import functools

import jax
import jax.numpy as jnp
from jax.experimental import pallas as pl
from jax.experimental.pallas import tpu as pltpu

_LANE = 128


def _round_up(x, m):
    return ((x + m - 1) // m) * m


def _cdiv(a, b):
    return (a + b - 1) // b


def _sublane(dtype):
    # 8 for 32-bit, 16 for bf16, 32 for 8-bit.
    return (8 * 4) // jnp.dtype(dtype).itemsize


def _vmem_budget_bytes():
    """~75% of this generation's VMEM (≈48 MiB on v7x, ≈96 MiB on v5e/v6e)."""
    cap = 64 << 20  # conservative default = v7x per-TensorCore capacity
    try:
        cap = int(getattr(pltpu.get_tpu_info(), "vmem_capacity_bytes", cap))
    except Exception:
        pass
    return (cap * 3) // 4


def _largest_divisor_tile(total, desired, unit=_LANE):
    """Largest multiple of `unit` that divides `total` and is <= max(desired, unit)."""
    desired = max(desired, unit)
    n_units = total // unit
    best = 1
    for d in range(1, n_units + 1):
        if n_units % d == 0 and d * unit <= desired:
            best = d
    return best * unit


# ---------------------------------------------------------------------------
# Kernels
# ---------------------------------------------------------------------------
def _ffn_kernel_resident(x_ref, w1_ref, b1_ref, w2_ref, b2_ref, o_ref):
    # Weights have constant block indices => DMA'd once, resident in VMEM.
    h = jnp.dot(x_ref[...], w1_ref[...], preferred_element_type=jnp.float32)
    h = jnp.maximum(h + b1_ref[...].astype(jnp.float32), 0.0)
    # TODO(synk): training-mode dropout would use pltpu.prng_seed +
    #             pltpu.stateful_bernoulli; eval mode is the identity, so skipped.
    out = jnp.dot(h.astype(w2_ref.dtype), w2_ref[...],
                  preferred_element_type=jnp.float32)
    o_ref[...] = (out + b2_ref[...].astype(jnp.float32)).astype(o_ref.dtype)


def _ffn_kernel_stream(x_ref, w1_ref, b1_ref, w2_ref, b2_ref, o_ref, acc_ref):
    # Grid: (row tiles, d_ff chunks); d_ff is the reduction axis (last, "arbitrary").
    f = pl.program_id(1)
    nf = pl.num_programs(1)

    @pl.when(f == 0)
    def _():
        acc_ref[...] = jnp.zeros_like(acc_ref)

    h = jnp.dot(x_ref[...], w1_ref[...], preferred_element_type=jnp.float32)
    h = jnp.maximum(h + b1_ref[...].astype(jnp.float32), 0.0)
    part = jnp.dot(h.astype(w2_ref.dtype), w2_ref[...],
                   preferred_element_type=jnp.float32)

    @pl.when(f < nf - 1)
    def _():
        acc_ref[...] += part

    @pl.when(f == nf - 1)
    def _():
        # Final chunk fused with the epilogue: skips one acc read-modify-write,
        # and b2 is added exactly once per output tile.
        o_ref[...] = (acc_ref[...] + part
                      + b2_ref[...].astype(jnp.float32)).astype(o_ref.dtype)


# ---------------------------------------------------------------------------
# Wrapper
# ---------------------------------------------------------------------------
@functools.partial(jax.jit, static_argnames=("tile_m", "tile_f", "compute_dtype"))
def positionwise_ffn(x, w1, b1, w2, b2, tile_m=1024, tile_f=None, compute_dtype=None):
    """x: (..., d_model). Applies relu(x @ W1 + b1) @ W2 + b2 row-wise.

    Weights are [in, out] (pre-transposed vs. nn.Linear).  For best perf pass
    weights from `prepare_ffn_params` (pre-padded, optionally bf16) so the
    per-call padding/cast below becomes a no-op.
    """
    orig_shape = x.shape
    orig_dtype = x.dtype
    d_model = orig_shape[-1]

    cdtype = jnp.dtype(compute_dtype) if compute_dtype is not None else jnp.dtype(x.dtype)
    sub = _sublane(cdtype)

    x2d = x.reshape(-1, d_model).astype(cdtype)
    rows = x2d.shape[0]

    # Lane-dense feature dims (multiples of 128). Zero-padding is exact: padded
    # x cols hit zero W1 rows; padded d_ff lanes give relu(0)=0 against zero W2
    # rows; padded output cols are sliced off.  With prepare_ffn_params these
    # pads are zero-width no-ops.
    d_model_p = _round_up(w1.shape[0], _LANE)
    d_ff_p = _round_up(w1.shape[1], _LANE)

    x2d = jnp.pad(x2d, ((0, 0), (0, d_model_p - d_model)))
    w1p = jnp.pad(w1.astype(cdtype),
                  ((0, d_model_p - w1.shape[0]), (0, d_ff_p - w1.shape[1])))
    w2p = jnp.pad(w2.astype(cdtype),
                  ((0, d_ff_p - w2.shape[0]), (0, d_model_p - w2.shape[1])))
    b1p = jnp.pad(b1.reshape(1, -1), ((0, 0), (0, d_ff_p - b1.size)))
    b2p = jnp.pad(b2.reshape(1, -1), ((0, 0), (0, d_model_p - b2.size)))

    x_bytes = cdtype.itemsize
    w_bytes = cdtype.itemsize
    out_bytes = jnp.dtype(orig_dtype).itemsize
    budget = _vmem_budget_bytes()

    # ---- Row tiling: divide rows as evenly as possible (no big dead last tile).
    rows_sub = _round_up(max(rows, 1), sub)
    tm = min(_round_up(tile_m, sub), rows_sub)
    n_row_tiles = _cdiv(rows_sub, tm)
    tm = _round_up(_cdiv(rows_sub, n_row_tiles), sub)

    def resident_est(tm_):
        # Conservative: weights counted as double-buffered even though their
        # block index never changes; includes f32 intermediates.
        return (2 * tm_ * d_model_p * x_bytes          # x tile (double-buffered)
                + 2 * d_model_p * d_ff_p * w_bytes     # W1
                + 2 * d_ff_p * d_model_p * w_bytes     # W2
                + 2 * sub * d_ff_p * w_bytes           # b1 (sublane-padded)
                + 2 * sub * d_model_p * w_bytes        # b2 (sublane-padded)
                + 2 * tm_ * d_model_p * out_bytes      # out tile
                + tm_ * d_ff_p * 4                     # f32 h = relu(x@W1+b1)
                + tm_ * d_model_p * 4)                 # f32 h@W2 before cast

    # ---- Weights-resident fast path.
    tm_res = tm
    while tm_res > sub and resident_est(tm_res) > budget:
        tm_res = max(sub, _round_up(tm_res // 2, sub))
    resident = resident_est(tm_res) <= budget

    if resident:
        tm = tm_res
        # v7x megacore: give the "parallel" rows axis >= 2 tiles when possible.
        if rows_sub // tm < 2 and rows_sub >= 2 * sub:
            tm = _round_up(_cdiv(rows_sub, 2), sub)
        rows_p = _round_up(rows, tm)
        x2d = jnp.pad(x2d, ((0, rows_p - rows), (0, 0)))
        grid = (rows_p // tm,)
        vmem_est = resident_est(tm)

        flops = 4 * rows_p * d_model_p * d_ff_p
        bytes_accessed = (rows_p * d_model_p * (x_bytes + out_bytes)
                          + (2 * d_model_p * d_ff_p + d_ff_p + d_model_p) * w_bytes)

        out = pl.pallas_call(
            _ffn_kernel_resident,
            out_shape=jax.ShapeDtypeStruct((rows_p, d_model_p), orig_dtype),
            grid_spec=pltpu.PrefetchScalarGridSpec(
                num_scalar_prefetch=0,
                grid=grid,
                in_specs=[
                    pl.BlockSpec((tm, d_model_p), lambda i: (i, 0)),       # x rows
                    pl.BlockSpec((d_model_p, d_ff_p), lambda i: (0, 0)),   # W1 (resident)
                    pl.BlockSpec((1, d_ff_p), lambda i: (0, 0)),           # b1
                    pl.BlockSpec((d_ff_p, d_model_p), lambda i: (0, 0)),   # W2 (resident)
                    pl.BlockSpec((1, d_model_p), lambda i: (0, 0)),        # b2
                ],
                out_specs=pl.BlockSpec((tm, d_model_p), lambda i: (i, 0)),
            ),
            compiler_params=pltpu.CompilerParams(
                dimension_semantics=("parallel",),
                vmem_limit_bytes=min(max(int(vmem_est * 1.25) + (2 << 20), 16 << 20),
                                     budget),
            ),
            cost_estimate=pl.CostEstimate(
                flops=flops, transcendentals=0, bytes_accessed=bytes_accessed),
        )(x2d, w1p, b1p, w2p, b2p)

        return out[:rows, :d_model].reshape(orig_shape)

    # ---- Streaming fallback: d_ff tiled as a reduction with an f32 accumulator.
    tf = _largest_divisor_tile(d_ff_p, tile_f if tile_f is not None else 1024)

    def stream_est(tm_, tf_):
        return (2 * tm_ * d_model_p * x_bytes          # x tile (double-buffered)
                + 2 * d_model_p * tf_ * w_bytes        # W1 chunk
                + 2 * tf_ * d_model_p * w_bytes        # W2 chunk
                + 2 * sub * tf_ * w_bytes              # b1 chunk (sublane-padded)
                + 2 * sub * d_model_p * w_bytes        # b2 (sublane-padded)
                + 2 * tm_ * d_model_p * out_bytes      # out tile
                + tm_ * d_model_p * 4                  # f32 accumulator scratch
                + tm_ * tf_ * 4                        # f32 ReLU intermediate
                + tm_ * d_model_p * 4)                 # f32 partial before accumulate

    while stream_est(tm, tf) > budget and (tm > sub or tf > _LANE):
        if tf >= tm and tf > _LANE:
            tf = _largest_divisor_tile(d_ff_p, tf // 2)
        else:
            tm = max(sub, _round_up(tm // 2, sub))

    rows_p = _round_up(rows, tm)
    x2d = jnp.pad(x2d, ((0, rows_p - rows), (0, 0)))
    grid = (rows_p // tm, d_ff_p // tf)
    vmem_est = stream_est(tm, tf)

    n_row_tiles = rows_p // tm
    flops = 4 * rows_p * d_model_p * d_ff_p
    # Weights are re-streamed once per row tile on this path.
    bytes_accessed = (rows_p * d_model_p * (x_bytes + out_bytes)
                      + n_row_tiles * (2 * d_model_p * d_ff_p + d_ff_p) * w_bytes
                      + d_model_p * w_bytes)

    out = pl.pallas_call(
        _ffn_kernel_stream,
        out_shape=jax.ShapeDtypeStruct((rows_p, d_model_p), orig_dtype),
        grid_spec=pltpu.PrefetchScalarGridSpec(
            num_scalar_prefetch=0,
            grid=grid,
            in_specs=[
                pl.BlockSpec((tm, d_model_p), lambda i, f: (i, 0)),   # x rows tile
                pl.BlockSpec((d_model_p, tf), lambda i, f: (0, f)),   # W1 d_ff chunk
                pl.BlockSpec((1, tf), lambda i, f: (0, f)),           # b1 chunk
                pl.BlockSpec((tf, d_model_p), lambda i, f: (f, 0)),   # W2 d_ff chunk
                pl.BlockSpec((1, d_model_p), lambda i, f: (0, 0)),    # b2 (constant)
            ],
            out_specs=pl.BlockSpec((tm, d_model_p), lambda i, f: (i, 0)),
            scratch_shapes=[pltpu.VMEM((tm, d_model_p), jnp.float32)],
        ),
        compiler_params=pltpu.CompilerParams(
            dimension_semantics=("parallel", "arbitrary"),
            vmem_limit_bytes=min(max(int(vmem_est * 1.25) + (2 << 20), 16 << 20),
                                 budget),
        ),
        cost_estimate=pl.CostEstimate(
            flops=flops, transcendentals=0, bytes_accessed=bytes_accessed),
    )(x2d, w1p, b1p, w2p, b2p)

    return out[:rows, :d_model].reshape(orig_shape)


# ---------------------------------------------------------------------------
# Parameter helpers
# ---------------------------------------------------------------------------
def prepare_ffn_params(w1, b1, w2, b2, compute_dtype=None):
    """Pad weights to lane-dense shapes ONCE (outside the per-call hot path) and
    optionally cast the big matrices to a cheaper MXU dtype (e.g. bf16).
    Biases stay in their original (typically f32) dtype."""
    cdtype = jnp.dtype(compute_dtype) if compute_dtype is not None else w1.dtype
    d_model, d_ff = w1.shape
    d_model_p = _round_up(d_model, _LANE)
    d_ff_p = _round_up(d_ff, _LANE)
    w1p = jnp.pad(w1.astype(cdtype), ((0, d_model_p - d_model), (0, d_ff_p - d_ff)))
    w2p = jnp.pad(w2.astype(cdtype), ((0, d_ff_p - d_ff), (0, d_model_p - d_model)))
    b1p = jnp.pad(b1.reshape(1, -1), ((0, 0), (0, d_ff_p - d_ff)))
    b2p = jnp.pad(b2.reshape(1, -1), ((0, 0), (0, d_model_p - d_model)))
    return w1p, b1p, w2p, b2p


def init_params(key, d_model, d_ff, dtype=jnp.float32):
    """Deterministic init mirroring nn.Linear's uniform(-1/sqrt(fan_in), ...)."""
    k1, k2, k3, k4 = jax.random.split(key, 4)
    bound1 = 1.0 / (d_model ** 0.5)
    bound2 = 1.0 / (d_ff ** 0.5)
    # Stored pre-transposed as [in, out] so the kernel multiplies x @ W.
    w1 = jax.random.uniform(k1, (d_model, d_ff), dtype, -bound1, bound1)
    b1 = jax.random.uniform(k2, (1, d_ff), dtype, -bound1, bound1)
    w2 = jax.random.uniform(k3, (d_ff, d_model), dtype, -bound2, bound2)
    b2 = jax.random.uniform(k4, (1, d_model), dtype, -bound2, bound2)
    return w1, b1, w2, b2


if __name__ == "__main__":
    key = jax.random.PRNGKey(0)
    kx, kp = jax.random.split(key)

    batch, seq, d_model, d_ff = 2, 8, 32, 64
    x = jax.random.normal(kx, (batch, seq, d_model), jnp.float32)
    w1, b1, w2, b2 = init_params(kp, d_model, d_ff)

    # Reference in plain JAX (eval-mode dropout == identity).
    ref = jnp.maximum(x @ w1 + b1[0], 0.0) @ w2 + b2[0]

    # 1) f32 path (per-call padding; exercises the weights-resident fast path).
    out = jax.block_until_ready(positionwise_ffn(x, w1, b1, w2, b2))
    assert out.shape == x.shape and out.dtype == x.dtype
    assert jnp.allclose(out, ref, atol=1e-5, rtol=1e-4), "f32 mismatch vs reference"

    # 2) bf16 compute path: weights padded + cast once, outside the hot loop.
    w1b, b1b, w2b, b2b = prepare_ffn_params(w1, b1, w2, b2, compute_dtype=jnp.bfloat16)
    out_bf16 = jax.block_until_ready(
        positionwise_ffn(x, w1b, b1b, w2b, b2b, compute_dtype=jnp.bfloat16))
    assert out_bf16.shape == x.shape and out_bf16.dtype == x.dtype
    assert jnp.allclose(out_bf16, ref, atol=1e-1, rtol=1e-1), "bf16 mismatch vs reference"

    print("KERNEL_OK")
</pallas_src>

<mosaic_0001>
module attributes {stable_mosaic.version = 11 : i64} {
  func.func @_ffn_kernel_resident(%arg0: i32, %arg1: memref<8x128xf32, #tpu.memory_space<vmem>>, %arg2: memref<128x128xf32, #tpu.memory_space<vmem>>, %arg3: memref<1x128xf32, #tpu.memory_space<vmem>>, %arg4: memref<128x128xf32, #tpu.memory_space<vmem>>, %arg5: memref<1x128xf32, #tpu.memory_space<vmem>>, %arg6: memref<8x128xf32, #tpu.memory_space<vmem>>) attributes {dimension_semantics = [#tpu.dimension_semantics<parallel>], iteration_bounds = array<i64: 2>, scalar_prefetch = 0 : i64, scratch_operands = 0 : i64, tpu.core_type = #tpu.core_type<tc>, window_params = [{transform_indices = @transform_0, window_bounds = array<i64: 8, 128>}, {pipeline_mode = #tpu.pipeline_mode<synchronous>, transform_indices = @transform_1, window_bounds = array<i64: 128, 128>}, {pipeline_mode = #tpu.pipeline_mode<synchronous>, transform_indices = @transform_2, window_bounds = array<i64: 1, 128>}, {pipeline_mode = #tpu.pipeline_mode<synchronous>, transform_indices = @transform_3, window_bounds = array<i64: 128, 128>}, {pipeline_mode = #tpu.pipeline_mode<synchronous>, transform_indices = @transform_4, window_bounds = array<i64: 1, 128>}, {transform_indices = @transform_5, window_bounds = array<i64: 8, 128>}]} {
    %c0 = arith.constant 0 : index
    %c0_0 = arith.constant 0 : index
    %0 = vector.load %arg1[%c0, %c0_0] : memref<8x128xf32, #tpu.memory_space<vmem>>, vector<8x128xf32>
    %c0_1 = arith.constant 0 : index
    %c0_2 = arith.constant 0 : index
    %1 = vector.load %arg2[%c0_1, %c0_2] : memref<128x128xf32, #tpu.memory_space<vmem>>, vector<128x128xf32>
    %cst = arith.constant dense<0.000000e+00> : vector<8x128xf32>
    %2 = tpu.matmul %0, %1, %cst {dimension_numbers = #tpu.dot_dimension_numbers<[1], [0], [0], [1], [0, 0, 1, 1], [], []>} : vector<8x128xf32>, vector<128x128xf32>, vector<8x128xf32> -> vector<8x128xf32>
    %c0_3 = arith.constant 0 : index
    %c0_4 = arith.constant 0 : index
    %3 = vector.load %arg3[%c0_3, %c0_4] : memref<1x128xf32, #tpu.memory_space<vmem>>, vector<1x128xf32>
    %4 = vector.broadcast %3 : vector<1x128xf32> to vector<8x128xf32>
    %5 = arith.addf %2, %4 : vector<8x128xf32>
    %cst_5 = arith.constant 0.000000e+00 : f32
    %6 = vector.broadcast %cst_5 : f32 to vector<8x128xf32>
    %7 = arith.maximumf %5, %6 : vector<8x128xf32>
    %c0_6 = arith.constant 0 : index
    %c0_7 = arith.constant 0 : index
    %8 = vector.load %arg4[%c0_6, %c0_7] : memref<128x128xf32, #tpu.memory_space<vmem>>, vector<128x128xf32>
    %cst_8 = arith.constant dense<0.000000e+00> : vector<8x128xf32>
    %9 = tpu.matmul %7, %8, %cst_8 {dimension_numbers = #tpu.dot_dimension_numbers<[1], [0], [0], [1], [0, 0, 1, 1], [], []>} : vector<8x128xf32>, vector<128x128xf32>, vector<8x128xf32> -> vector<8x128xf32>
    %c0_9 = arith.constant 0 : index
    %c0_10 = arith.constant 0 : index
    %10 = vector.load %arg5[%c0_9, %c0_10] : memref<1x128xf32, #tpu.memory_space<vmem>>, vector<1x128xf32>
    %11 = vector.broadcast %10 : vector<1x128xf32> to vector<8x128xf32>
    %12 = arith.addf %9, %11 : vector<8x128xf32>
    %c0_11 = arith.constant 0 : index
    %c0_12 = arith.constant 0 : index
    %13 = vector.load %arg6[%c0_11, %c0_12] : memref<8x128xf32, #tpu.memory_space<vmem>>, vector<8x128xf32>
    tpu.vector_store %arg6[%c0_11, %c0_12], %12 {strides = array<i32>} : memref<8x128xf32, #tpu.memory_space<vmem>>, vector<8x128xf32>,
    return
  }
  func.func @transform_0(%arg0: i32) -> (i32, i32) {
    %c0_i32 = arith.constant 0 : i32
    %c0_i32_0 = arith.constant 0 : i32
    return %arg0, %c0_i32 : i32, i32
  }
  func.func @transform_1(%arg0: i32) -> (i32, i32) {
    %c0_i32 = arith.constant 0 : i32
    %c0_i32_0 = arith.constant 0 : i32
    %c0_i32_1 = arith.constant 0 : i32
    return %c0_i32, %c0_i32_0 : i32, i32
  }
  func.func @transform_2(%arg0: i32) -> (i32, i32) {
    %c0_i32 = arith.constant 0 : i32
    %c0_i32_0 = arith.constant 0 : i32
    %c0_i32_1 = arith.constant 0 : i32
    return %c0_i32, %c0_i32_0 : i32, i32
  }
  func.func @transform_3(%arg0: i32) -> (i32, i32) {
    %c0_i32 = arith.constant 0 : i32
    %c0_i32_0 = arith.constant 0 : i32
    %c0_i32_1 = arith.constant 0 : i32
    return %c0_i32, %c0_i32_0 : i32, i32
  }
  func.func @transform_4(%arg0: i32) -> (i32, i32) {
    %c0_i32 = arith.constant 0 : i32
    %c0_i32_0 = arith.constant 0 : i32
    %c0_i32_1 = arith.constant 0 : i32
    return %c0_i32, %c0_i32_0 : i32, i32
  }
  func.func @transform_5(%arg0: i32) -> (i32, i32) {
    %c0_i32 = arith.constant 0 : i32
    %c0_i32_0 = arith.constant 0 : i32
    return %arg0, %c0_i32 : i32, i32
  }
}

</mosaic_0001>

<bundles_post_ra>
// kernel: positionwise_ffn.1
= control target key start
LH: loop header
LB: loop body
LE: loop exit
PB: predicated region body
PF: predicated region fallthrough
CT: control target
= control target key end

     0   :  { %s413_s18 = smov 0   ;;  %s543_s0 = inlined_call_operand.vmem [shape: f32[16,128], index: 0, kind: input, shape index: {}]   ;;  %s544_s1 = inlined_call_operand.vmem [shape: f32[128,128], index: 1, kind: input, shape index: {}]   ;;  %s545_s2 = inlined_call_operand.vmem [shape: f32[1,128], index: 2, kind: input, shape index: {}]   ;;  %s546_s3 = inlined_call_operand.vmem [shape: f32[128,128], index: 3, kind: input, shape index: {}]   ;;  %s547_s4 = inlined_call_operand.vmem [shape: f32[1,128], index: 4, kind: input, shape index: {}]   ;;  %s548_s5 = inlined_call_operand.vmem [shape: f32[16,128], index: 5, kind: output, shape index: {}]  }
   0x1 LB: > { %s356_s19 = sadd.s32 4294967295, %s381_s18   ;;  %p360_p0 = scmp.ge.s32.totalorder %s381_s18, 1  ;;  %s381_s18 = sphi %s413_s18, %s15_s18  }
   0x2   : > { %p186_p1 = scmp.lt.s32.totalorder %s381_s18, 3 }
   0x4   : > { %p187_p2 = pnand %p360_p0, %p186_p1 }
   0x5   : > { %p212_p3 = scmp.lt.s32.totalorder (!%p187_p2), %s356_s19, 1 }
   0x6   : > { %190 = sbr.rel (%p187_p2) target bundleno = 302 (0x12e), region = 40 }
   0xb   : > { %v236_v0 = vld [vmem:[%s544_s1 + $0x78] sm:$0xff]  ;;  %v235_v1 = vld [vmem:[%s544_s1 + $0x70] sm:$0xff]  ;;  %v234_v2 = vld [vmem:[%s544_s1 + $0x68] sm:$0xff]  ;;  %s550_s19 = smov (!%p212_p3, %s356_s19), 1 }
   0xc   : > { %241 = vmatpush.msra.mxu0 %v236_v0  ;;  %v233_v3 = vld [vmem:[%s544_s1 + $0x60] sm:$0xff]  ;;  %v277_v4 = vld [vmem:[%s546_s3 + $0x78] sm:$0xff]  ;;  %v276_v5 = vld [vmem:[%s546_s3 + $0x70] sm:$0xff]  ;;  %s361_s20 = sshll.u32 %s550_s19, 3 }
   0xd   : > { %v232_v6 = vld [vmem:[%s544_s1 + $0x58] sm:$0xff]  ;;  %282 = vmatpush.msra.mxu1 %v277_v4  ;;  %v275_v7 = vld [vmem:[%s546_s3 + $0x68] sm:$0xff]  ;;  %v231_v8 = vld [vmem:[%s544_s1 + $0x50] sm:$0xff]  ;;  %s215_s6 = scalar_lea.vmem %s543_s0, %s361_s20  ;;  %s219_s26 = scalar_lea.vmem %s548_s5, %s361_s20 }
   0xe   : > { %242 = vmatpush.msra.mxu0 %v235_v1  ;;  %v274_v9 = vld [vmem:[%s546_s3 + $0x60] sm:$0xff]  ;;  %v230_v10 = vld [vmem:[%s544_s1 + $0x48] sm:$0xff]  ;;  %v273_v11 = vld [vmem:[%s546_s3 + $0x58] sm:$0xff] }
   0xf   : > { %283 = vmatpush.msra.mxu1 %v276_v5  ;;  %v229_v12 = vld [vmem:[%s544_s1 + $0x40] sm:$0xff]  ;;  %v272_v13 = vld [vmem:[%s546_s3 + $0x50] sm:$0xff]  ;;  %v228_v14 = vld [vmem:[%s544_s1 + $0x38] sm:$0xff] }
  0x10   : > { %243 = vmatpush.msra.mxu0 %v234_v2  ;;  %v271_v15 = vld [vmem:[%s546_s3 + $0x48] sm:$0xff]  ;;  %v227_v16 = vld [vmem:[%s544_s1 + $0x30] sm:$0xff]  ;;  %v270_v17 = vld [vmem:[%s546_s3 + $0x40] sm:$0xff] }
  0x11   : > { %284 = vmatpush.msra.mxu1 %v275_v7  ;;  %v226_v18 = vld [vmem:[%s544_s1 + $0x28] sm:$0xff]  ;;  %v269_v19 = vld [vmem:[%s546_s3 + $0x38] sm:$0xff]  ;;  %v225_v20 = vld [vmem:[%s544_s1 + $0x20] sm:$0xff] }
  0x12   : > { %244 = vmatpush.msra.mxu0 %v233_v3  ;;  %v268_v21 = vld [vmem:[%s546_s3 + $0x30] sm:$0xff]  ;;  %v224_v22 = vld [vmem:[%s544_s1 + $0x18] sm:$0xff]  ;;  %v267_v23 = vld [vmem:[%s546_s3 + $0x28] sm:$0xff] }
  0x13   : > { %285 = vmatpush.msra.mxu1 %v274_v9  ;;  %v223_v24 = vld [vmem:[%s544_s1 + $0x10] sm:$0xff]  ;;  %v266_v25 = vld [vmem:[%s546_s3 + $0x20] sm:$0xff]  ;;  %v222_v26 = vld [vmem:[%s544_s1 + $0x8] sm:$0xff] }
  0x14   : > { %245 = vmatpush.msra.mxu0 %v232_v6  ;;  %v265_v27 = vld [vmem:[%s546_s3 + $0x18] sm:$0xff]  ;;  %v221_v28 = vld [vmem:[%s544_s1] sm:$0xff]  ;;  %v264_v30 = vld [vmem:[%s546_s3 + $0x10] sm:$0xff] }
  0x15   : > { %286 = vmatpush.msra.mxu1 %v273_v11  ;;  %v220_v29 = vld [vmem:[%s215_s6] sm:$0xff]  ;;  %v263_v31 = vld [vmem:[%s546_s3 + $0x8] sm:$0xff] }
  0x16   : > { %246 = vmatpush.msra.mxu0 %v231_v8  ;;  %v262_v32 = vld [vmem:[%s546_s3] sm:$0xff] }
  0x17   : > { %287 = vmatpush.msra.mxu1 %v272_v13  ;;  %v373_v33 = vld [vmem:[%s545_s2] ss:$0 sm:$0xff] }
  0x18   : > { %247 = vmatpush.msra.mxu0 %v230_v10  ;;  %v374_v37 = vld [vmem:[%s547_s4] ss:$0 sm:$0xff] }
  0x19   : > { %288 = vmatpush.msra.mxu1 %v271_v15 }
  0x1a   : > { %248 = vmatpush.msra.mxu0 %v229_v12 }
  0x1b   : > { %289 = vmatpush.msra.mxu1 %v270_v17 }
  0x1c   : > { %249 = vmatpush.msra.mxu0 %v228_v14 }
  0x1d   : > { %290 = vmatpush.msra.mxu1 %v269_v19 }
  0x1e   : > { %250 = vmatpush.msra.mxu0 %v227_v16 }
  0x1f   : > { %291 = vmatpush.msra.mxu1 %v268_v21 }
  0x20   : > { %251 = vmatpush.msra.mxu0 %v226_v18 }
  0x21   : > { %292 = vmatpush.msra.mxu1 %v267_v23 }
  0x22   : > { %252 = vmatpush.msra.mxu0 %v225_v20 }
  0x23   : > { %293 = vmatpush.msra.mxu1 %v266_v25 }
  0x24   : > { %253 = vmatpush.msra.mxu0 %v224_v22 }
  0x25   : > { %294 = vmatpush.msra.mxu1 %v265_v27 }
  0x26   : > { %254 = vmatpush.msra.mxu0 %v223_v24 }
  0x27   : > { %295 = vmatpush.msra.mxu1 %v264_v30 }
  0x28   : > { %255 = vmatpush.msra.mxu0 %v222_v26 }
  0x29   : > { %296 = vmatpush.msra.mxu1 %v263_v31 }
  0x2a   : > { %256 = vmatpush.msra.mxu0 %v221_v28 }
  0x2b   : > { %257 = vmatmul.f32.vlgmr.msra.gmra.mxu0 %v220_v29  ;;  %297 = vmatpush.msra.mxu1 %v262_v32 }
  0xa8   : > { %v258_v34 = vpop.f32.mrf.mxu0 }
  0xa9   : > { %v259_v35 = vadd.f32 %v373_v33, %v258_v34 }
  0xab   : > { %v261_v36 = vmax.f32 %v259_v35, 0.0 }
  0xad   : > { %298 = vmatmul.f32.vlgmr.msra.gmra.mxu1 %v261_v36 }
 0x12a   : > { %v299_v38 = vpop.f32.mrf.mxu1 }
 0x12b   : > { %v300_v39 = vadd.f32 %v374_v37, %v299_v38 }
 0x12d   : > { %302 = vst [vmem:[%s219_s26] sm:$0xff] %v300_v39 }
 0x12e PF: > { %s15_s18 = sadd.s32 1, %s381_s18  }
 0x12f   : > { %p12_p4 = scmp.ge.s32.totalorder %s15_s18, 4  }
 0x131   :  { %14 = sbr.rel (!%p12_p4) target bundleno = 1 (0x1), region = 70 }

</bundles_post_ra>
